<compile_context>
chip_gen: v7x
topology: tpu7x:2x2x1
jax: 0.10.0
libtpu: 0.0.40
codegen_flags: <defaults>
</compile_context>

<pallas_src>
import functools

import jax
import jax.numpy as jnp
from jax.experimental import pallas as pl
from jax.experimental.pallas import tpu as pltpu

NMS_RADIUS = 2  # kernel_size = 2*r + 1 = 5, stride = 1, padding = r


def _tree_max(vals):
    """Balanced pairwise maximum over a list of equally-shaped arrays."""
    vals = list(vals)
    while len(vals) > 1:
        nxt = [jnp.maximum(vals[i], vals[i + 1]) for i in range(0, len(vals) - 1, 2)]
        if len(vals) % 2:
            nxt.append(vals[-1])
        vals = nxt
    return vals[0]


def _maxpool_kernel(x_ref, o_ref, xw_ref, xh_ref, *, radius: int):
    # x_ref / o_ref : (Bt, H, W) VMEM blocks.
    # xw_ref        : (Bt, H, W + 2r) scratch (horizontal halo of -inf).
    # xh_ref        : (Bt, H + 2r, W) scratch (vertical halo of -inf).
    r = radius
    bt, h, w = o_ref.shape
    dt = o_ref.dtype
    if jnp.issubdtype(dt, jnp.floating):
        pad_val = jnp.array(-jnp.inf, dt)
    else:  # integer inputs: use dtype min as the "never wins" sentinel.
        pad_val = jnp.array(jnp.iinfo(dt).min, dt)

    # Halo strips are tiny; (re)write them every step so the kernel has no
    # cross-iteration state (safe under "parallel" grid semantics / megacore).
    xw_ref[:, :, 0:r] = jnp.full((bt, h, r), pad_val, dt)
    xw_ref[:, :, w + r:w + 2 * r] = jnp.full((bt, h, r), pad_val, dt)
    xh_ref[:, 0:r, :] = jnp.full((bt, r, w), pad_val, dt)
    xh_ref[:, h + r:h + 2 * r, :] = jnp.full((bt, r, w), pad_val, dt)

    # ---- Horizontal (lane) pass: out[w] = max_{|dx|<=r} x[w+dx] ----
    xw_ref[:, :, r:r + w] = x_ref[...]
    hmax = _tree_max([xw_ref[:, :, dx:dx + w] for dx in range(2 * r + 1)])

    # ---- Vertical (sublane) pass on the horizontal result ----
    xh_ref[:, r:r + h, :] = hmax
    o_ref[...] = _tree_max([xh_ref[:, dy:dy + h, :] for dy in range(2 * r + 1)])


def max_pool(x: jax.Array, nms_radius: int = NMS_RADIUS) -> jax.Array:
    """Sliding-window max over (H, W), window (2r+1)^2, stride 1, 'same' output.

    Matches nn.MaxPool2d(kernel_size=2r+1, stride=1, padding=r) on x.unsqueeze(1)
    followed by squeeze(1).
    """
    if nms_radius == 0:
        return x
    B, H, W = x.shape
    r = nms_radius
    itemsize = jnp.dtype(x.dtype).itemsize
    per_img = H * W * itemsize

    # Fold as many batch elements per grid step as fit in a ~4 MiB block (amortizes
    # per-step overhead for small score maps). Bt must divide B so every block is full.
    target_block_bytes = 4 * 1024 * 1024
    bt = 1
    for d in range(1, B + 1):
        if B % d == 0 and d * per_img <= target_block_bytes:
            bt = d
    block_bytes = bt * per_img
    grid = (B // bt,)

    # 2x double-buffered input + 2x output + ~2x scratch halo buffers + headroom.
    vmem_limit = int(min(64 * 1024 * 1024, max(32 * 1024 * 1024, 6 * block_bytes)))

    kernel = functools.partial(_maxpool_kernel, radius=r)
    return pl.pallas_call(
        kernel,
        out_shape=jax.ShapeDtypeStruct((B, H, W), x.dtype),
        grid_spec=pltpu.PrefetchScalarGridSpec(
            num_scalar_prefetch=0,
            grid=grid,
            in_specs=[pl.BlockSpec((bt, H, W), lambda i: (i, 0, 0))],
            out_specs=pl.BlockSpec((bt, H, W), lambda i: (i, 0, 0)),
            scratch_shapes=[
                pltpu.VMEM((bt, H, W + 2 * r), x.dtype),
                pltpu.VMEM((bt, H + 2 * r, W), x.dtype),
            ],
        ),
        compiler_params=pltpu.CompilerParams(
            dimension_semantics=("parallel",),
            vmem_limit_bytes=vmem_limit,
        ),
    )(x)


def _reference(x: jax.Array, nms_radius: int) -> jax.Array:
    k = 2 * nms_radius + 1
    return jax.lax.reduce_window(
        x, -jnp.inf, jax.lax.max,
        window_dimensions=(1, k, k),
        window_strides=(1, 1, 1),
        padding=((0, 0), (nms_radius, nms_radius), (nms_radius, nms_radius)),
    )


if __name__ == "__main__":
    key = jax.random.PRNGKey(0)
    for shape in ((2, 16, 16), (3, 24, 40)):
        key, sub = jax.random.split(key)
        x = jax.random.normal(sub, shape, dtype=jnp.float32)
        out = jax.block_until_ready(max_pool(x, NMS_RADIUS))
        ref = _reference(x, NMS_RADIUS)
        assert out.shape == shape
        assert jnp.allclose(out, ref), f"Pallas max-pool mismatch vs reference for {shape}"
    print("KERNEL_OK")
</pallas_src>

<mosaic_0001>
module attributes {stable_mosaic.version = 11 : i64} {
  func.func @_maxpool_kernel(%arg0: i32, %arg1: memref<2x16x16xf32, #tpu.memory_space<vmem>>, %arg2: memref<2x16x16xf32, #tpu.memory_space<vmem>>, %arg3: memref<2x16x20xf32, #tpu.memory_space<vmem>>, %arg4: memref<2x20x16xf32, #tpu.memory_space<vmem>>) attributes {dimension_semantics = [#tpu.dimension_semantics<parallel>], iteration_bounds = array<i64: 1>, scalar_prefetch = 0 : i64, scratch_operands = 2 : i64, tpu.core_type = #tpu.core_type<tc>, window_params = [{transform_indices = @transform_0, window_bounds = array<i64: 2, 16, 16>}, {transform_indices = @transform_1, window_bounds = array<i64: 2, 16, 16>}]} {
    %cst = arith.constant 0xFF800000 : f32
    %0 = vector.broadcast %cst : f32 to vector<2x16x2xf32>
    %c0 = arith.constant 0 : index
    %c0_0 = arith.constant 0 : index
    %c0_1 = arith.constant 0 : index
    %1 = vector.load %arg3[%c0, %c0_0, %c0_1] : memref<2x16x20xf32, #tpu.memory_space<vmem>>, vector<2x16x2xf32>
    tpu.vector_store %arg3[%c0, %c0_0, %c0_1], %0 {strides = array<i32>} : memref<2x16x20xf32, #tpu.memory_space<vmem>>, vector<2x16x2xf32>,
    %cst_2 = arith.constant 0xFF800000 : f32
    %2 = vector.broadcast %cst_2 : f32 to vector<2x16x2xf32>
    %c0_3 = arith.constant 0 : index
    %c0_4 = arith.constant 0 : index
    %c18 = arith.constant 18 : index
    %3 = vector.load %arg3[%c0_3, %c0_4, %c18] : memref<2x16x20xf32, #tpu.memory_space<vmem>>, vector<2x16x2xf32>
    tpu.vector_store %arg3[%c0_3, %c0_4, %c18], %2 {strides = array<i32>} : memref<2x16x20xf32, #tpu.memory_space<vmem>>, vector<2x16x2xf32>,
    %cst_5 = arith.constant 0xFF800000 : f32
    %4 = vector.broadcast %cst_5 : f32 to vector<2x2x16xf32>
    %c0_6 = arith.constant 0 : index
    %c0_7 = arith.constant 0 : index
    %c0_8 = arith.constant 0 : index
    %5 = vector.load %arg4[%c0_6, %c0_7, %c0_8] : memref<2x20x16xf32, #tpu.memory_space<vmem>>, vector<2x2x16xf32>
    tpu.vector_store %arg4[%c0_6, %c0_7, %c0_8], %4 {strides = array<i32>} : memref<2x20x16xf32, #tpu.memory_space<vmem>>, vector<2x2x16xf32>,
    %cst_9 = arith.constant 0xFF800000 : f32
    %6 = vector.broadcast %cst_9 : f32 to vector<2x2x16xf32>
    %c0_10 = arith.constant 0 : index
    %c18_11 = arith.constant 18 : index
    %c0_12 = arith.constant 0 : index
    %7 = vector.load %arg4[%c0_10, %c18_11, %c0_12] : memref<2x20x16xf32, #tpu.memory_space<vmem>>, vector<2x2x16xf32>
    tpu.vector_store %arg4[%c0_10, %c18_11, %c0_12], %6 {strides = array<i32>} : memref<2x20x16xf32, #tpu.memory_space<vmem>>, vector<2x2x16xf32>,
    %c0_13 = arith.constant 0 : index
    %c0_14 = arith.constant 0 : index
    %c0_15 = arith.constant 0 : index
    %8 = vector.load %arg1[%c0_13, %c0_14, %c0_15] : memref<2x16x16xf32, #tpu.memory_space<vmem>>, vector<2x16x16xf32>
    %c0_16 = arith.constant 0 : index
    %c0_17 = arith.constant 0 : index
    %c2 = arith.constant 2 : index
    %9 = vector.load %arg3[%c0_16, %c0_17, %c2] : memref<2x16x20xf32, #tpu.memory_space<vmem>>, vector<2x16x16xf32>
    tpu.vector_store %arg3[%c0_16, %c0_17, %c2], %8 {strides = array<i32>} : memref<2x16x20xf32, #tpu.memory_space<vmem>>, vector<2x16x16xf32>,
    %c0_18 = arith.constant 0 : index
    %c0_19 = arith.constant 0 : index
    %c0_20 = arith.constant 0 : index
    %10 = vector.load %arg3[%c0_18, %c0_19, %c0_20] : memref<2x16x20xf32, #tpu.memory_space<vmem>>, vector<2x16x16xf32>
    %c0_21 = arith.constant 0 : index
    %c0_22 = arith.constant 0 : index
    %c1 = arith.constant 1 : index
    %11 = vector.load %arg3[%c0_21, %c0_22, %c1] : memref<2x16x20xf32, #tpu.memory_space<vmem>>, vector<2x16x16xf32>
    %c0_23 = arith.constant 0 : index
    %c0_24 = arith.constant 0 : index
    %c2_25 = arith.constant 2 : index
    %12 = vector.load %arg3[%c0_23, %c0_24, %c2_25] : memref<2x16x20xf32, #tpu.memory_space<vmem>>, vector<2x16x16xf32>
    %c0_26 = arith.constant 0 : index
    %c0_27 = arith.constant 0 : index
    %c3 = arith.constant 3 : index
    %13 = vector.load %arg3[%c0_26, %c0_27, %c3] : memref<2x16x20xf32, #tpu.memory_space<vmem>>, vector<2x16x16xf32>
    %c0_28 = arith.constant 0 : index
    %c0_29 = arith.constant 0 : index
    %c4 = arith.constant 4 : index
    %14 = vector.load %arg3[%c0_28, %c0_29, %c4] : memref<2x16x20xf32, #tpu.memory_space<vmem>>, vector<2x16x16xf32>
    %15 = arith.maximumf %10, %11 : vector<2x16x16xf32>
    %16 = arith.maximumf %12, %13 : vector<2x16x16xf32>
    %17 = arith.maximumf %15, %16 : vector<2x16x16xf32>
    %18 = arith.maximumf %17, %14 : vector<2x16x16xf32>
    %c0_30 = arith.constant 0 : index
    %c2_31 = arith.constant 2 : index
    %c0_32 = arith.constant 0 : index
    %19 = vector.load %arg4[%c0_30, %c2_31, %c0_32] : memref<2x20x16xf32, #tpu.memory_space<vmem>>, vector<2x16x16xf32>
    tpu.vector_store %arg4[%c0_30, %c2_31, %c0_32], %18 {strides = array<i32>} : memref<2x20x16xf32, #tpu.memory_space<vmem>>, vector<2x16x16xf32>,
    %c0_33 = arith.constant 0 : index
    %c0_34 = arith.constant 0 : index
    %c0_35 = arith.constant 0 : index
    %20 = vector.load %arg4[%c0_33, %c0_34, %c0_35] : memref<2x20x16xf32, #tpu.memory_space<vmem>>, vector<2x16x16xf32>
    %c0_36 = arith.constant 0 : index
    %c1_37 = arith.constant 1 : index
    %c0_38 = arith.constant 0 : index
    %21 = vector.load %arg4[%c0_36, %c1_37, %c0_38] : memref<2x20x16xf32, #tpu.memory_space<vmem>>, vector<2x16x16xf32>
    %c0_39 = arith.constant 0 : index
    %c2_40 = arith.constant 2 : index
    %c0_41 = arith.constant 0 : index
    %22 = vector.load %arg4[%c0_39, %c2_40, %c0_41] : memref<2x20x16xf32, #tpu.memory_space<vmem>>, vector<2x16x16xf32>
    %c0_42 = arith.constant 0 : index
    %c3_43 = arith.constant 3 : index
    %c0_44 = arith.constant 0 : index
    %23 = vector.load %arg4[%c0_42, %c3_43, %c0_44] : memref<2x20x16xf32, #tpu.memory_space<vmem>>, vector<2x16x16xf32>
    %c0_45 = arith.constant 0 : index
    %c4_46 = arith.constant 4 : index
    %c0_47 = arith.constant 0 : index
    %24 = vector.load %arg4[%c0_45, %c4_46, %c0_47] : memref<2x20x16xf32, #tpu.memory_space<vmem>>, vector<2x16x16xf32>
    %25 = arith.maximumf %20, %21 : vector<2x16x16xf32>
    %26 = arith.maximumf %22, %23 : vector<2x16x16xf32>
    %27 = arith.maximumf %25, %26 : vector<2x16x16xf32>
    %28 = arith.maximumf %27, %24 : vector<2x16x16xf32>
    %c0_48 = arith.constant 0 : index
    %c0_49 = arith.constant 0 : index
    %c0_50 = arith.constant 0 : index
    %29 = vector.load %arg2[%c0_48, %c0_49, %c0_50] : memref<2x16x16xf32, #tpu.memory_space<vmem>>, vector<2x16x16xf32>
    tpu.vector_store %arg2[%c0_48, %c0_49, %c0_50], %28 {strides = array<i32>} : memref<2x16x16xf32, #tpu.memory_space<vmem>>, vector<2x16x16xf32>,
    return
  }
  func.func @transform_0(%arg0: i32) -> (i32, i32, i32) {
    %c0_i32 = arith.constant 0 : i32
    %c0_i32_0 = arith.constant 0 : i32
    %c0_i32_1 = arith.constant 0 : i32
    return %arg0, %c0_i32, %c0_i32_0 : i32, i32, i32
  }
  func.func @transform_1(%arg0: i32) -> (i32, i32, i32) {
    %c0_i32 = arith.constant 0 : i32
    %c0_i32_0 = arith.constant 0 : i32
    %c0_i32_1 = arith.constant 0 : i32
    return %arg0, %c0_i32, %c0_i32_0 : i32, i32, i32
  }
}

</mosaic_0001>

<bundles_post_ra>
// kernel: tpu_custom_call.1
= control target key start
LH: loop header
LB: loop body
LE: loop exit
PB: predicated region body
PF: predicated region fallthrough
CT: control target
= control target key end

     0   :  { %6 = vsyncpa [#allocation5], 0  ;;  %s299_s0 = inlined_call_operand.hbm [shape: f32[2,16,16], index: 0, kind: input, shape index: {}]   ;;  %s300_s1 = inlined_call_operand.hbm [shape: f32[2,16,16], index: 1, kind: output, shape index: {}]  }
   0x1   :  { %7 = vsyncpa [#allocation6], 0  ;;  %s242_s6 = smov [#allocation4]   ;;  %s194_s10 = scalar_lea.hbm %s299_s0, 512 }
   0x2   :  { %s13_s7 = sshll.u32 %s242_s6, 4  ;;  %p195_p0 = scmp.ne.s32.totalorder %s299_s0, %s194_s10  ;;  %s14_s7 = int_to_ptr.vmem [resolvable:$true] %s13_s7 }
   0x3   :  { %p198_p1 = scmp.lt.u32.totalorder %s194_s10, %s299_s0 }
   0x5   :  { %p200_p2 = pnand %p198_p1, %p195_p0 }
   0x7   :  { %203 = shalt.err (!%p200_p2)
}
   0x8   :  { %s204_s15 = scalar_lea.vmem %s14_s7, 512  ;;  %p209_p4 = scmp.lt.s32.totalorder %s14_s7, %s14_s7 }
   0x9   :  { %p205_p3 = scmp.ne.s32.totalorder %s14_s7, %s204_s15  ;;  %p210_p5 = scmp.lt.s32.totalorder %s204_s15, %s204_s15 }
   0xb   :  { %p211_p6 = por %p210_p5, %p209_p4 }
   0xd   :  { %p212_p7 = pnand %p211_p6, %p205_p3 }
   0xf   :  { %215 = shalt.err (!%p212_p7)
}
  0x10   :  { %s243_s16 = smov 128   ;;  %s244_s17 = smov 8  }
  0x11   :  { %19 = dma.hbm_to_vmem [thread:$0]  %s299_s0, 512, %s14_s7, [#allocation5], %s243_s16, %s243_s16, %s244_s17  }
  0x12   :  { %238 = dma.done.wait [#allocation5], 512  }
  0x13   :  { %239 = vsyncadd [#allocation5], 4294966784  ;;  %vm23_vm0 = vcmask 15360   ;;  %vm28_vm1 = vcmask 162960   ;;  %v245_v0 = vmov -inf   ;;  %v38_v1 = vld [vmem:[#allocation4] sm:$0xff] }
  0x14   :  { %24 = vst.msk [vmem:[#allocation2] sm:$0xff] %vm23_vm0, %v245_v0  ;;  %25 = vst.msk [vmem:[#allocation2 + $0x8] sm:$0xff] %vm23_vm0, %v245_v0  ;;  %v40_v2 = vld [vmem:[#allocation4 + $0x10] sm:$0xff]  ;;  %s246_s20 = smov 2   ;;  %v39_v3 = vld [vmem:[#allocation4 + $0x8] sm:$0xff]  ;;  %vm58_vm2 = vcmask 146448  }
  0x15   :  { %26 = vst.msk [vmem:[#allocation2 + $0x10] sm:$0xff] %vm23_vm0, %v245_v0  ;;  %27 = vst.msk [vmem:[#allocation2 + $0x18] sm:$0xff] %vm23_vm0, %v245_v0  ;;  %46 = vrot.lane.b32.xlu0 %v38_v1, %s246_s20  ;;  %50 = vrot.lane.b32.xlu1 %v40_v2, %s246_s20  ;;  %v41_v4 = vld [vmem:[#allocation4 + $0x18] sm:$0xff]  ;;  %s247_s0 = smov 127   ;;  %s248_s21 = smov 124   ;;  %vm33_vm3 = vcmask 123904  }
  0x16   :  { %29 = vst.msk [vmem:[#allocation2] sm:$0xff] %vm28_vm1, %v245_v0  ;;  %31 = vst.msk [vmem:[#allocation2 + $0x10] sm:$0xff] %vm28_vm1, %v245_v0  ;;  %s249_s22 = smov 126   ;;  %vm123_vm4 = vcmask 130048   ;;  %s250_s23 = smov [#allocation7]  }
  0x17   :  { %30 = vst.msk [vmem:[#allocation2 + $0x8] sm:$0xff] %vm28_vm1, %v245_v0  ;;  %32 = vst.msk [vmem:[#allocation2 + $0x18] sm:$0xff] %vm28_vm1, %v245_v0  ;;  %s173_s24 = sshll.u32 %s250_s23, 4  ;;  %s174_s24 = int_to_ptr.vmem [resolvable:$true] %s173_s24 }
  0x18   :  { %34 = vst.msk [vmem:[#allocation3] sm:$0x3] %vm33_vm3, %v245_v0  ;;  %35 = vst.msk [vmem:[#allocation3 + $0x18] sm:$0x3] %vm33_vm3, %v245_v0  ;;  %s216_s25 = scalar_lea.vmem %s174_s24, 512  ;;  %p221_p9 = scmp.lt.s32.totalorder %s174_s24, %s174_s24 }
  0x19   :  { %48 = vrot.lane.b32.xlu0 %v39_v3, %s246_s20  ;;  %52 = vrot.lane.b32.xlu1 %v41_v4, %s246_s20  ;;  %36 = vst.msk [vmem:[#allocation3 + $0x12] sm:$0x3] %vm33_vm3, %v245_v0  ;;  %37 = vst.msk [vmem:[#allocation3 + $0x2a] sm:$0x3] %vm33_vm3, %v245_v0  ;;  %p217_p8 = scmp.ne.s32.totalorder %s174_s24, %s216_s25  ;;  %p222_p10 = scmp.lt.s32.totalorder %s216_s25, %s216_s25 }
  0x1b   :  { %p223_p11 = por %p222_p10, %p221_p9 }
  0x1d   :  { %p224_p12 = pnand %p223_p11, %p217_p8 }
  0x87   :  { %v47_v5 = vpop.permute.xlu0 %46  ;;  %v51_v6 = vpop.permute.xlu1 %50 }
  0x88   :  { %59 = vst.msk [vmem:[#allocation2] sm:$0xff] %vm58_vm2, %v47_v5  ;;  %61 = vst.msk [vmem:[#allocation2 + $0x10] sm:$0xff] %vm58_vm2, %v51_v6 }
  0x8b   :  { %v49_v7 = vpop.permute.xlu0 %48  ;;  %v53_v8 = vpop.permute.xlu1 %52 }
  0x8c   :  { %60 = vst.msk [vmem:[#allocation2 + $0x8] sm:$0xff] %vm58_vm2, %v49_v7  ;;  %62 = vst.msk [vmem:[#allocation2 + $0x18] sm:$0xff] %vm58_vm2, %v53_v8 }
  0x8f   :  { %v63_v9 = vld [vmem:[#allocation2] sm:$0xff]  ;;  %v65_v10 = vld [vmem:[#allocation2 + $0x10] sm:$0xff] }
  0x90   :  { %71 = vrot.lane.b32.xlu0 %v63_v9, %s247_s0 }
  0x93   :  { %v64_v11 = vld [vmem:[#allocation2 + $0x8] sm:$0xff]  ;;  %v66_v12 = vld [vmem:[#allocation2 + $0x18] sm:$0xff] }
  0x94   :  { %73 = vrot.lane.b32.xlu1 %v64_v11, %s247_s0  ;;  %75 = vrot.lane.b32.xlu0 %v65_v10, %s247_s0 }
  0x98   :  { %77 = vrot.lane.b32.xlu1 %v66_v12, %s247_s0  ;;  %107 = vrot.lane.b32.xlu0 %v63_v9, %s248_s21 }
  0x9c   :  { %109 = vrot.lane.b32.xlu1 %v64_v11, %s248_s21 }
 0x102   :  { %v72_v13 = vpop.permute.xlu0 %71 }
 0x103   :  { %v83_v14 = vmax.f32 %v63_v9, %v72_v13 }
 0x105   :  { %91 = vrot.lane.b32.xlu0 %v83_v14, %s249_s22 }
 0x106   :  { %v74_v15 = vpop.permute.xlu1 %73  ;;  %v76_v16 = vpop.permute.xlu0 %75 }
 0x107   :  { %v84_v17 = vmax.f32 %v64_v11, %v74_v15  ;;  %v85_v18 = vmax.f32 %v65_v10, %v76_v16 }
 0x109   :  { %93 = vrot.lane.b32.xlu1 %v84_v17, %s249_s22  ;;  %95 = vrot.lane.b32.xlu0 %v85_v18, %s249_s22 }
 0x10a   :  { %v78_v19 = vpop.permute.xlu1 %77  ;;  %v108_v21 = vpop.permute.xlu0 %107 }
 0x10b   :  { %v86_v20 = vmax.f32 %v66_v12, %v78_v19 }
 0x10d   :  { %97 = vrot.lane.b32.xlu1 %v86_v20, %s249_s22  ;;  %111 = vrot.lane.b32.xlu0 %v65_v10, %s248_s21 }
 0x10e   :  { %v110_v22 = vpop.permute.xlu1 %109 }
 0x111   :  { %113 = vrot.lane.b32.xlu1 %v66_v12, %s248_s21 }
 0x177   :  { %v92_v23 = vpop.permute.xlu0 %91 }
 0x178   :  { %v103_v24 = vmax.f32 %v83_v14, %v92_v23 }
 0x17a   :  { %v119_v25 = vmax.f32 %v103_v24, %v108_v21 }
 0x17b   :  { %v94_v26 = vpop.permute.xlu1 %93  ;;  %v96_v27 = vpop.permute.xlu0 %95 }
 0x17c   :  { %124 = vst.msk [vmem:[#allocation3 + $0x2] sm:$0xff] %vm123_vm4, %v119_v25  ;;  %v104_v28 = vmax.f32 %v84_v17, %v94_v26  ;;  %v105_v30 = vmax.f32 %v85_v18, %v96_v27 }
 0x17e   :  { %v120_v29 = vmax.f32 %v104_v28, %v110_v22 }
 0x17f   :  { %v98_v31 = vpop.permute.xlu1 %97  ;;  %v112_v32 = vpop.permute.xlu0 %111 }
 0x180   :  { %125 = vst.msk [vmem:[#allocation3 + $0xa] sm:$0xff] %vm123_vm4, %v120_v29  ;;  %v121_v33 = vmax.f32 %v105_v30, %v112_v32  ;;  %v106_v34 = vmax.f32 %v86_v20, %v98_v31 }
 0x182   :  { %126 = vst.msk [vmem:[#allocation3 + $0x1a] sm:$0xff] %vm123_vm4, %v121_v33 }
 0x183   :  { %v114_v35 = vpop.permute.xlu1 %113  ;;  %v128_v37 = vld [vmem:[#allocation3] sm:$0xff] }
 0x184   :  { %v122_v36 = vmax.f32 %v106_v34, %v114_v35  ;;  %v132_v38 = vld [vmem:[#allocation3 + $0x1] sm:$0xff] }
 0x185   :  { %v136_v42 = vld [vmem:[#allocation3 + $0x2] sm:$0xff]  ;;  %v148_v46 = vmax.f32 %v128_v37, %v132_v38 }
 0x186   :  { %127 = vst.msk [vmem:[#allocation3 + $0x22] sm:$0xff] %vm123_vm4, %v122_v36 }
 0x187   :  { %v129_v39 = vld [vmem:[#allocation3 + $0x8] sm:$0xff] }
 0x188   :  { %v133_v40 = vld [vmem:[#allocation3 + $0x9] sm:$0xff] }
 0x189   :  { %v137_v41 = vld [vmem:[#allocation3 + $0xa] sm:$0xff]  ;;  %v149_v45 = vmax.f32 %v129_v39, %v133_v40  ;;  %v130_v52 = vld [vmem:[#allocation3 + $0x18] sm:$0xff] }
 0x18a   :  { %v140_v43 = vld [vmem:[#allocation3 + $0x3] sm:$0xff]  ;;  %v141_v44 = vld [vmem:[#allocation3 + $0xb] sm:$0xff]  ;;  %v134_v53 = vld [vmem:[#allocation3 + $0x19] sm:$0xff] }
 0x18b   :  { %v152_v47 = vmax.f32 %v136_v42, %v140_v43  ;;  %v153_v48 = vmax.f32 %v137_v41, %v141_v44  ;;  %v144_v49 = vld [vmem:[#allocation3 + $0x4] sm:$0xff]  ;;  %v145_v54 = vld [vmem:[#allocation3 + $0xc] sm:$0xff]  ;;  %v138_v60 = vld [vmem:[#allocation3 + $0x1a] sm:$0xff]  ;;  %v150_v0 = vmax.f32 %v130_v52, %v134_v53 }
 0x18d   :  { %v156_v50 = vmax.f32 %v148_v46, %v152_v47  ;;  %v157_v51 = vmax.f32 %v149_v45, %v153_v48  ;;  %v131_v55 = vld [vmem:[#allocation3 + $0x20] sm:$0xff] }
 0x18e   :  { %v135_v56 = vld [vmem:[#allocation3 + $0x21] sm:$0xff] }
 0x18f   :  { %v139_v57 = vld [vmem:[#allocation3 + $0x22] sm:$0xff]  ;;  %v160_v58 = vmax.f32 %v156_v50, %v144_v49  ;;  %v161_v59 = vmax.f32 %v157_v51, %v145_v54  ;;  %v151_v63 = vmax.f32 %v131_v55, %v135_v56 }
 0x190   :  { %v142_v61 = vld [vmem:[#allocation3 + $0x1b] sm:$0xff]  ;;  %v143_v62 = vld [vmem:[#allocation3 + $0x23] sm:$0xff] }
 0x191   :  { %v154_v1 = vmax.f32 %v138_v60, %v142_v61  ;;  %v155_v2 = vmax.f32 %v139_v57, %v143_v62  ;;  %164 = vst.msk [vmem:[#allocation7] sm:$0xff] %vm123_vm4, %v160_v58  ;;  %165 = vst.msk [vmem:[#allocation7 + $0x8] sm:$0xff] %vm123_vm4, %v161_v59  ;;  %v146_v5 = vld [vmem:[#allocation3 + $0x1c] sm:$0xff]  ;;  %v147_v6 = vld [vmem:[#allocation3 + $0x24] sm:$0xff] }
 0x193   :  { %v158_v3 = vmax.f32 %v150_v0, %v154_v1  ;;  %v159_v4 = vmax.f32 %v151_v63, %v155_v2 }
 0x195   :  { %v162_v7 = vmax.f32 %v158_v3, %v146_v5  ;;  %v163_v8 = vmax.f32 %v159_v4, %v147_v6 }
 0x197   :  { %166 = vst.msk [vmem:[#allocation7 + $0x10] sm:$0xff] %vm123_vm4, %v162_v7  ;;  %167 = vst.msk [vmem:[#allocation7 + $0x18] sm:$0xff] %vm123_vm4, %v163_v8 }
 0x198   :  { %227 = shalt.err (!%p224_p12)
}
 0x199   :  { %s228_s28 = scalar_lea.hbm %s300_s1, 512 }
 0x19a   :  { %p229_p13 = scmp.ne.s32.totalorder %s300_s1, %s228_s28  ;;  %p232_p0 = scmp.lt.u32.totalorder %s228_s28, %s300_s1 }
 0x19c   :  { %p234_p1 = pnand %p232_p0, %p229_p13 }
 0x19e   :  { %237 = shalt.err (!%p234_p1)
}
 0x19f   :  { %179 = dma.vmem_to_hbm [thread:$0]  %s174_s24, 512, %s300_s1, [#allocation6], %s243_s16, %s243_s16, %s244_s17  }
 0x1a0   :  { %240 = dma.done.wait [#allocation6], 512  }
 0x1a1   :  { %241 = vsyncadd [#allocation6], 4294966784 }
 0x1a2   :  { %183 = vsyncpa [#allocation5], 1 }
 0x1a3   :  { %184 = vsyncpa [#allocation6], 1 }

</bundles_post_ra>
